<compile_context>
chip_gen: v7x
topology: tpu7x:2x2x1
jax: 0.10.0
libtpu: 0.0.40
codegen_flags: <defaults>
</compile_context>

<pallas_src>
import jax
import jax.numpy as jnp
from jax.experimental import pallas as pl
from jax.experimental.pallas import tpu as pltpu


# ----------------------------------------------------------------------------- kernel


def residual_block_kernel(x_ref, wcat_ref, w2_ref, bias_ref, o_ref):
    """One (batch, spatial-tile) grid step.

    x_ref    : (1, Cin, tm)  f32   input pixels (channels on sublanes, pixels on lanes)
    wcat_ref : (2*C, Cin)    cd    rows [0:C] = conv1 (BN1 folded, T), [C:] = downsample
    w2_ref   : (C, C)        cd    conv2 weight (BN2 folded, transposed)
    bias_ref : (3*C, 1)      f32   rows [0:C]=b1, [C:2C]=bd, [2C:]=b2
    o_ref    : (1, C, tm)    cd    output tile (compute dtype; lane-dense store)
    """
    c = w2_ref.shape[0]

    # Cast to the compute dtype in-kernel: free on the VPU under the DMA bottleneck and
    # avoids a separate wrapper-side cast pass over x in HBM.
    x = x_ref[0].astype(wcat_ref.dtype)                                  # (Cin, tm)

    # Fused conv1 + downsample: one MXU pass over the shared LHS (BN scales pre-folded).
    hr = jnp.dot(wcat_ref[...], x, preferred_element_type=jnp.float32)   # (2C, tm) f32

    h = jnp.maximum(hr[:c, :] + bias_ref[:c, :], 0.0)                     # conv1+BN1+ReLU
    res = hr[c:, :] + bias_ref[c:2 * c, :]                                # downsample+BNd

    # conv2 + BN2 (scale folded into w2); cast h to compute dtype only at the MXU boundary.
    o = jnp.dot(w2_ref[...], h.astype(w2_ref.dtype),
                preferred_element_type=jnp.float32)
    o = o + bias_ref[2 * c:, :]

    # residual add + final ReLU; store in compute dtype (lane-dense, unmasked).
    o_ref[0] = jnp.maximum(o + res, 0.0).astype(o_ref.dtype)


# ----------------------------------------------------------------------------- wrapper


def _round_up(x, m):
    return ((x + m - 1) // m) * m


def _fold_bn(gamma, beta, mean, var, conv_bias, eps):
    # BN(conv(x)) = s * (x @ W) + t,  s = gamma/sqrt(var+eps),  t = s*(bias-mean)+beta
    s = gamma / jnp.sqrt(var + eps)
    t = s * (conv_bias - mean) + beta
    return s, t


def _vmem_limits():
    """(tile-budget bytes, scoped-vmem compiler limit bytes), generation-aware."""
    try:
        cap = int(pltpu.get_tpu_info().vmem_capacity_bytes)
    except Exception:
        cap = 64 * 1024 * 1024          # conservative fallback: v7x per-TC VMEM
    budget = min(int(cap * 0.60), 76 * 1024 * 1024)   # ~38 MiB on v7x, ~76 MiB v5e/v6e
    limit = min(int(cap * 0.75), 96 * 1024 * 1024)    # 48 MiB on v7x,  96 MiB v5e/v6e
    return budget, limit


def residual_block_forward(x_nchw, params, *, compute_dtype=jnp.bfloat16, eps=1e-5):
    N, Cin, H, W = x_nchw.shape
    Cout = params["w1"].shape[1]
    HW = H * W

    # ---- fold eval-mode BatchNorm into conv weights / biases (tiny, done once) --------
    s1, t1 = _fold_bn(params["g1"], params["be1"], params["m1"], params["v1"], params["b1"], eps)
    s2, t2 = _fold_bn(params["g2"], params["be2"], params["m2"], params["v2"], params["b2"], eps)
    sd, td = _fold_bn(params["gd"], params["bed"], params["md"], params["vd"], params["bd"], eps)

    # Weights are stored (Cin, Cout): fold BN scale into output channels, transpose to
    # (Cout, Cin) so the kernel computes W @ x with pixels on the lane axis.
    w1t = (params["w1"] * s1[None, :]).T                                  # (Cout, Cin)
    wdt = (params["wd"] * sd[None, :]).T                                  # (Cout, Cin)
    w2t = (params["w2"] * s2[None, :]).T                                  # (Cout, Cout)

    # Round Cout up to a multiple of 8 so the hr[:C]/hr[C:] split lands on a sublane-tile
    # boundary (no XLU relayouts). Padded rows/cols are zero -> padded channels are zero.
    Cp = _round_up(Cout, 8)
    if Cp != Cout:
        p = Cp - Cout
        w1t = jnp.pad(w1t, ((0, p), (0, 0)))
        wdt = jnp.pad(wdt, ((0, p), (0, 0)))
        w2t = jnp.pad(w2t, ((0, p), (0, p)))
        t1 = jnp.pad(t1, (0, p))
        td = jnp.pad(td, (0, p))
        t2 = jnp.pad(t2, (0, p))

    wcat = jnp.concatenate([w1t, wdt], axis=0).astype(compute_dtype)      # (2*Cp, Cin)
    w2c = w2t.astype(compute_dtype)                                       # (Cp, Cp)
    bias = jnp.concatenate([t1, td, t2], axis=0).reshape(3 * Cp, 1).astype(jnp.float32)
    # NOTE: for large real ResNet widths one could additionally zero-pad Cin to the MXU
    # tile (128 on v5e, 256 on v6e/v7x); skipped here since it would add an HBM pass
    # over x and the small-channel regime is purely DMA-bound.

    # ---- pick the spatial tile from a VMEM budget (HBM-bound: biggest tile that fits) --
    cdb = jnp.dtype(compute_dtype).itemsize
    per_px = (2 * Cin * 4                  # double-buffered f32 input tile
              + 2 * Cp * cdb               # double-buffered output tile (compute dtype)
              + Cin * cdb                  # in-kernel x cast copy
              + 2 * Cp * 4                 # hr (f32)
              + 3 * Cp * 4                 # h, res, o (f32)
              + Cp * cdb)                  # h cast before the 2nd matmul
    budget, vmem_limit = _vmem_limits()

    tm = max(128, min((budget // per_px) // 128 * 128, 65536))
    hw128 = _round_up(HW, 128)
    tm = min(tm, hw128)
    if N == 1 and hw128 >= 256:
        # v7x shards parallel grid axes over 2 TensorCores: keep at least 2 grid steps.
        tm = min(tm, _round_up(pl.cdiv(hw128, 2), 128))
    num_tiles = pl.cdiv(hw128, tm)
    tm = _round_up(pl.cdiv(hw128, num_tiles), 128)   # re-balance to minimize padding
    HW_pad = tm * num_tiles

    # ---- channels-first view of x: pure reshape (no HBM pass), stays f32 ---------------
    x3d = x_nchw.reshape(N, Cin, HW)
    if HW_pad != HW:
        # Only at lane-unaligned HW; padded tail values are discarded by the final slice.
        x3d = jnp.pad(x3d, ((0, 0), (0, 0), (0, HW_pad - HW)))

    grid = (N, num_tiles)
    full = lambda shape: pl.BlockSpec(shape, lambda n, j: (0, 0))

    out3d = pl.pallas_call(
        residual_block_kernel,
        out_shape=jax.ShapeDtypeStruct((N, Cp, HW_pad), compute_dtype),
        grid_spec=pltpu.PrefetchScalarGridSpec(
            num_scalar_prefetch=0,
            grid=grid,
            in_specs=[
                pl.BlockSpec((1, Cin, tm), lambda n, j: (n, 0, j)),   # lane-dense pixel tile
                full((2 * Cp, Cin)),      # fused conv1|downsample weights (resident)
                full((Cp, Cp)),           # conv2 weights (resident)
                full((3 * Cp, 1)),        # packed BN biases (resident)
            ],
            out_specs=pl.BlockSpec((1, Cp, tm), lambda n, j: (n, 0, j)),
        ),
        compiler_params=pltpu.CompilerParams(
            # batch and spatial tiles are independent -> megacore / 2-TC sharding on v7x
            dimension_semantics=("parallel", "parallel"),
            vmem_limit_bytes=vmem_limit,
        ),
    )(x3d, wcat, w2c, bias)

    if HW_pad != HW:
        out3d = out3d[:, :, :HW]
    if Cp != Cout:
        out3d = out3d[:, :Cout, :]
    return out3d.reshape(N, Cout, H, W)   # output stays in compute dtype (bf16 by default)


# ----------------------------------------------------------------------------- test util


def make_params(key, in_channels, out_channels):
    ks = jax.random.split(key, 12)
    f32 = jnp.float32

    def w(k, cin, cout):
        # 1x1 conv weight (cout, cin, 1, 1) stored transposed as (cin, cout)
        return (0.1 * jax.random.normal(k, (cin, cout))).astype(f32)

    def vec(k, c, loc=0.0, scale=0.1):
        return (loc + scale * jax.random.normal(k, (c,))).astype(f32)

    return {
        # conv1 + BN1
        "w1": w(ks[0], in_channels, out_channels),
        "b1": vec(ks[1], out_channels),
        "g1": vec(ks[2], out_channels, loc=1.0),
        "be1": vec(ks[3], out_channels),
        "m1": vec(ks[4], out_channels),
        "v1": jnp.abs(vec(ks[5], out_channels, loc=1.0)) + 0.1,
        # conv2 + BN2
        "w2": w(ks[6], out_channels, out_channels),
        "b2": vec(ks[7], out_channels),
        "g2": vec(ks[8], out_channels, loc=1.0),
        "be2": vec(ks[9], out_channels),
        "m2": vec(ks[10], out_channels),
        "v2": jnp.abs(vec(ks[11], out_channels, loc=1.0)) + 0.1,
        # downsample conv + BN (in_channels != out_channels)
        "wd": w(jax.random.fold_in(key, 100), in_channels, out_channels),
        "bd": vec(jax.random.fold_in(key, 101), out_channels),
        "gd": vec(jax.random.fold_in(key, 102), out_channels, loc=1.0),
        "bed": vec(jax.random.fold_in(key, 103), out_channels),
        "md": vec(jax.random.fold_in(key, 104), out_channels),
        "vd": jnp.abs(vec(jax.random.fold_in(key, 105), out_channels, loc=1.0)) + 0.1,
    }


def residual_block_ref(x_nchw, params, eps=1e-5):
    # pure-JAX reference (eval-mode BN), for correctness check
    def conv1x1(x, w, b):  # x: NCHW, w: (Cin, Cout)
        y = jnp.einsum("nchw,cd->ndhw", x, w)
        return y + b[None, :, None, None]

    def bn(x, g, be, m, v):
        return (x - m[None, :, None, None]) / jnp.sqrt(v[None, :, None, None] + eps) \
               * g[None, :, None, None] + be[None, :, None, None]

    h = jnp.maximum(bn(conv1x1(x_nchw, params["w1"], params["b1"]),
                       params["g1"], params["be1"], params["m1"], params["v1"]), 0.0)
    o = bn(conv1x1(h, params["w2"], params["b2"]),
           params["g2"], params["be2"], params["m2"], params["v2"])
    r = bn(conv1x1(x_nchw, params["wd"], params["bd"]),
           params["gd"], params["bed"], params["md"], params["vd"])
    return jnp.maximum(o + r, 0.0)


if __name__ == "__main__":
    key = jax.random.PRNGKey(0)
    kx, kp = jax.random.split(key)

    N, Cin, Cout, H, W = 2, 4, 8, 16, 16
    x = jax.random.normal(kx, (N, Cin, H, W), dtype=jnp.float32)
    params = make_params(kp, Cin, Cout)

    ref = residual_block_ref(x, params)

    # f32 compute path: tight check against the eval-mode reference.
    out_f32 = jax.block_until_ready(
        residual_block_forward(x, params, compute_dtype=jnp.float32))
    assert out_f32.shape == (N, Cout, H, W)
    assert out_f32.dtype == jnp.float32
    assert jnp.allclose(out_f32, ref, atol=1e-5, rtol=1e-5)

    # bf16 compute path (default, bandwidth-optimized): f32 MXU accumulation, bf16
    # activations AND bf16 output (HBM-traffic win); loose tolerance vs f32 reference.
    out_bf16 = jax.block_until_ready(residual_block_forward(x, params))
    assert out_bf16.shape == (N, Cout, H, W)
    assert out_bf16.dtype == jnp.bfloat16
    assert jnp.allclose(out_bf16.astype(jnp.float32), ref, atol=5e-2, rtol=5e-2)

    print("KERNEL_OK")
</pallas_src>

<mosaic_0001>
module attributes {stable_mosaic.version = 11 : i64} {
  func.func @residual_block_kernel(%arg0: i32, %arg1: i32, %arg2: memref<1x4x256xf32, #tpu.memory_space<vmem>>, %arg3: memref<16x4xf32, #tpu.memory_space<vmem>>, %arg4: memref<8x8xf32, #tpu.memory_space<vmem>>, %arg5: memref<24x1xf32, #tpu.memory_space<vmem>>, %arg6: memref<1x8x256xf32, #tpu.memory_space<vmem>>) attributes {dimension_semantics = [#tpu.dimension_semantics<parallel>, #tpu.dimension_semantics<parallel>], iteration_bounds = array<i64: 2, 1>, scalar_prefetch = 0 : i64, scratch_operands = 0 : i64, tpu.core_type = #tpu.core_type<tc>, window_params = [{transform_indices = @transform_0, window_bounds = array<i64: 1, 4, 256>}, {pipeline_mode = #tpu.pipeline_mode<synchronous>, transform_indices = @transform_1, window_bounds = array<i64: 16, 4>}, {pipeline_mode = #tpu.pipeline_mode<synchronous>, transform_indices = @transform_2, window_bounds = array<i64: 8, 8>}, {pipeline_mode = #tpu.pipeline_mode<synchronous>, transform_indices = @transform_3, window_bounds = array<i64: 24, 1>}, {transform_indices = @transform_4, window_bounds = array<i64: 1, 8, 256>}]} {
    %c0 = arith.constant 0 : index
    %c0_0 = arith.constant 0 : index
    %c0_1 = arith.constant 0 : index
    %0 = vector.load %arg2[%c0, %c0_0, %c0_1] : memref<1x4x256xf32, #tpu.memory_space<vmem>>, vector<1x4x256xf32>
    %1 = vector.shape_cast %0 : vector<1x4x256xf32> to vector<4x256xf32>
    %c0_2 = arith.constant 0 : index
    %c0_3 = arith.constant 0 : index
    %2 = vector.load %arg3[%c0_2, %c0_3] : memref<16x4xf32, #tpu.memory_space<vmem>>, vector<16x4xf32>
    %cst = arith.constant dense<0.000000e+00> : vector<16x256xf32>
    %3 = tpu.matmul %2, %1, %cst {dimension_numbers = #tpu.dot_dimension_numbers<[1], [0], [0], [1], [0, 0, 1, 1], [], []>} : vector<16x4xf32>, vector<4x256xf32>, vector<16x256xf32> -> vector<16x256xf32>
    %4 = vector.extract_strided_slice %3 {offsets = [0, 0], sizes = [8, 256], strides = [1, 1]} : vector<16x256xf32> to vector<8x256xf32>
    %c0_4 = arith.constant 0 : index
    %c0_5 = arith.constant 0 : index
    %5 = vector.load %arg5[%c0_4, %c0_5] : memref<24x1xf32, #tpu.memory_space<vmem>>, vector<8x1xf32>
    %6 = vector.broadcast %5 : vector<8x1xf32> to vector<8x256xf32>
    %7 = arith.addf %4, %6 : vector<8x256xf32>
    %cst_6 = arith.constant 0.000000e+00 : f32
    %8 = vector.broadcast %cst_6 : f32 to vector<8x256xf32>
    %9 = arith.maximumf %7, %8 : vector<8x256xf32>
    %10 = vector.extract_strided_slice %3 {offsets = [8, 0], sizes = [8, 256], strides = [1, 1]} : vector<16x256xf32> to vector<8x256xf32>
    %c8 = arith.constant 8 : index
    %c0_7 = arith.constant 0 : index
    %11 = vector.load %arg5[%c8, %c0_7] : memref<24x1xf32, #tpu.memory_space<vmem>>, vector<8x1xf32>
    %12 = vector.broadcast %11 : vector<8x1xf32> to vector<8x256xf32>
    %13 = arith.addf %10, %12 : vector<8x256xf32>
    %c0_8 = arith.constant 0 : index
    %c0_9 = arith.constant 0 : index
    %14 = vector.load %arg4[%c0_8, %c0_9] : memref<8x8xf32, #tpu.memory_space<vmem>>, vector<8x8xf32>
    %cst_10 = arith.constant dense<0.000000e+00> : vector<8x256xf32>
    %15 = tpu.matmul %14, %9, %cst_10 {dimension_numbers = #tpu.dot_dimension_numbers<[1], [0], [0], [1], [0, 0, 1, 1], [], []>} : vector<8x8xf32>, vector<8x256xf32>, vector<8x256xf32> -> vector<8x256xf32>
    %c16 = arith.constant 16 : index
    %c0_11 = arith.constant 0 : index
    %16 = vector.load %arg5[%c16, %c0_11] : memref<24x1xf32, #tpu.memory_space<vmem>>, vector<8x1xf32>
    %17 = vector.broadcast %16 : vector<8x1xf32> to vector<8x256xf32>
    %18 = arith.addf %15, %17 : vector<8x256xf32>
    %19 = arith.addf %18, %13 : vector<8x256xf32>
    %cst_12 = arith.constant 0.000000e+00 : f32
    %20 = vector.broadcast %cst_12 : f32 to vector<8x256xf32>
    %21 = arith.maximumf %19, %20 : vector<8x256xf32>
    %c0_13 = arith.constant 0 : index
    %c0_14 = arith.constant 0 : index
    %c0_15 = arith.constant 0 : index
    %22 = vector.load %arg6[%c0_13, %c0_14, %c0_15] : memref<1x8x256xf32, #tpu.memory_space<vmem>>, vector<1x8x256xf32>
    %23 = vector.shape_cast %22 : vector<1x8x256xf32> to vector<8x256xf32>
    %24 = vector.shape_cast %21 : vector<8x256xf32> to vector<1x8x256xf32>
    tpu.vector_store %arg6[%c0_13, %c0_14, %c0_15], %24 {strides = array<i32>} : memref<1x8x256xf32, #tpu.memory_space<vmem>>, vector<1x8x256xf32>,
    return
  }
  func.func @transform_0(%arg0: i32, %arg1: i32) -> (i32, i32, i32) {
    %c0_i32 = arith.constant 0 : i32
    %c0_i32_0 = arith.constant 0 : i32
    return %arg0, %c0_i32, %arg1 : i32, i32, i32
  }
  func.func @transform_1(%arg0: i32, %arg1: i32) -> (i32, i32) {
    %c0_i32 = arith.constant 0 : i32
    %c0_i32_0 = arith.constant 0 : i32
    %c0_i32_1 = arith.constant 0 : i32
    return %c0_i32, %c0_i32_0 : i32, i32
  }
  func.func @transform_2(%arg0: i32, %arg1: i32) -> (i32, i32) {
    %c0_i32 = arith.constant 0 : i32
    %c0_i32_0 = arith.constant 0 : i32
    %c0_i32_1 = arith.constant 0 : i32
    return %c0_i32, %c0_i32_0 : i32, i32
  }
  func.func @transform_3(%arg0: i32, %arg1: i32) -> (i32, i32) {
    %c0_i32 = arith.constant 0 : i32
    %c0_i32_0 = arith.constant 0 : i32
    %c0_i32_1 = arith.constant 0 : i32
    return %c0_i32, %c0_i32_0 : i32, i32
  }
  func.func @transform_4(%arg0: i32, %arg1: i32) -> (i32, i32, i32) {
    %c0_i32 = arith.constant 0 : i32
    %c0_i32_0 = arith.constant 0 : i32
    return %arg0, %c0_i32, %arg1 : i32, i32, i32
  }
}

</mosaic_0001>

<bundles_post_ra>
// kernel: tpu_custom_call.1
= control target key start
LH: loop header
LB: loop body
LE: loop exit
PB: predicated region body
PF: predicated region fallthrough
CT: control target
= control target key end

     0   :  { %9 = vsyncpa [#allocation3], 0  ;;  %s844_s0 = inlined_call_operand.vmem [shape: f32[2,4,256], index: 0, kind: input, shape index: {}]   ;;  %s845_s1 = inlined_call_operand.vmem [shape: f32[16,4], index: 1, kind: input, shape index: {}]   ;;  %s846_s2 = inlined_call_operand.vmem [shape: f32[8,8], index: 2, kind: input, shape index: {}]   ;;  %s847_s3 = inlined_call_operand.vmem [shape: f32[24,1], index: 3, kind: input, shape index: {}]   ;;  %s848_s4 = inlined_call_operand.hbm [shape: f32[2,8,256], index: 4, kind: output, shape index: {}]  }
   0x1   :  { %11 = vsyncpa [#allocation3 + $0x1], 0  ;;  %s714_s15 = smov 0   ;;  %s716_s16 = smov 0  }
   0x2   :  { %s718_s17 = smov 0   ;;  %s720_s18 = smov 0  }
   0x3   :  { %s722_s19 = smov 0   ;;  %s724_s20 = smov 0  }
   0x4 LB: > { %s520_s21 = sadd.s32 4294967295, %s684_s20   ;;  %s521_s22 = sadd.s32 4294967294, %s684_s20   ;;  %s684_s20 = sphi %s724_s20, %s17_s20   ;;  %s680_s19 = sphi %s722_s19, %s855_s19   ;;  %s676_s18 = sphi %s720_s18, %s854_s18   ;;  %s672_s17 = sphi %s718_s17, %s853_s17   ;;  %s668_s16 = sphi %s716_s16, %s852_s16   ;;  %s664_s15 = sphi %s714_s15, %s851_s15  }
   0x5   : > { %s29_s23 = sadd.s32 1, %s680_s19  ;;  %s129_s24 = sadd.s32 1, %s672_s17 }
   0x6   : > { %p31_p0 = scmp.ge.s32.totalorder %s29_s23, 2  ;;  %p139_p1 = scmp.ne.s32.totalorder %s672_s17, %s668_s16 }
   0x7   : > { %p140_p2 = scmp.eq.s32.totalorder %s520_s21, 1  ;;  %p145_p3 = scmp.ne.s32.totalorder %s668_s16, %s664_s15 }
   0x8   : > { %s857_s23 = smov (%p31_p0, %s29_s23), 0  ;;  %p146_p5 = scmp.eq.s32.totalorder %s521_s22, 1 }
   0x9   : > { %p754_p4 = por %p140_p2, %p139_p1  ;;  %s124_s26 = ssub.s32 %s680_s19, %s857_s23 }
   0xa   : > { %p524_p6 = scmp.ge.s32.totalorder %s684_s20, 1  ;;  %p127_p7 = scmp.eq.s32.totalorder %s124_s26, 0 }
   0xb   : > { %p761_p8 = por %p146_p5, %p145_p3  ;;  %p186_p9 = scmp.lt.s32.totalorder %s684_s20, 3 }
   0xc   : > { %s767_s28 = scalar_select %p127_p7, %s672_s17, %s129_s24  }
   0xd   : > { %p187_p10 = pnand %p524_p6, %p186_p9 }
   0xe   : > { %p217_p11 = scmp.lt.s32.totalorder (!%p187_p10), %s676_s18, 1  ;;  %v686_v0 = vmov (!%p187_p10), 0.0   ;;  %v321_v1 = vld [vmem:[%s847_s3] sm:$0xff] (!%p187_p10)  ;;  %v340_v2 = vld [vmem:[%s847_s3 + $0x10] sm:$0xff] (!%p187_p10)  ;;  %v687_v3 = vmov (!%p187_p10), 0   ;;  %v331_v4 = vld [vmem:[%s847_s3 + $0x8] sm:$0xff] (!%p187_p10) }
   0xf   : > { %190 = sbr.rel (%p187_p10) target bundleno = 481 (0x1e1), region = 36  ;;  %308 = vmatprep.mubr.f32.mxu1 (!%p187_p10), %v686_v0  ;;  %414 = vmatprep.mubr.f32.mxu0 (!%p187_p10), %v686_v0  ;;  %vm239_vm0 = vcmask (!%p187_p10), 1043456   ;;  %v228_v7 = vld [vmem:[%s845_s1] sm:$0xff] (!%p187_p10)  ;;  %vm232_vm1 = vcmask (!%p187_p10), 31744   ;;  %v229_v8 = vld [vmem:[%s845_s1 + $0x8] sm:$0xff] (!%p187_p10)  ;;  %vm346_vm2 = vcmask (!%p187_p10), 64512  }
  0x10   : > { %603 = vset.pattern.permute.xlu0 (!%p187_p10), %v687_v3  ;;  %604 = vset.pattern.permute.xlu1 (!%p187_p10), %v687_v3  ;;  %v339_v18 = vld [vmem:[%s846_s2] sm:$0xff] (!%p187_p10)  ;;  %s213_s30 = sand.u32 (!%p187_p10), 1, %s668_s16   ;;  %s539_s6 = sshll.u32 (!%p187_p10), %s676_s18, 8 }
  0x11   : > { %324 = vperm.xlu0 (!%p187_p10), %603, %v321_v1   ;;  %343 = vperm.xlu1 (!%p187_p10), %604, %v340_v2   ;;  %s525_s5 = sshll.u32 (!%p187_p10), %s213_s30, 4  ;;  %s797_s11 = scalar_lea.hbm (!%p187_p10), %s848_s4, %s539_s6 }
  0x12   : > { %s428_s12 = scalar_lea.sflag (!%p187_p10), [#allocation3], %s213_s30 }
  0x15   : > { %334 = vperm.xlu0 (!%p187_p10), %603, %v331_v4  }
  0x16   : > { %s218_s7 = scalar_select %p217_p11, %s676_s18, 1 }
  0x17   : > { %s688_s18 = smov [#allocation2]  }
  0x18   : > { %s538_s8 = sshll.u32 %s218_s7, 3  ;;  %s215_s7 = scalar_lea.vmem [#allocation2], %s525_s5 }
  0x19   : > { %s224_s13 = scalar_lea.vmem %s844_s0, %s538_s8  ;;  %s444_s8 = sshll.u32 %s215_s7, 4  ;;  %s799_s8 = int_to_ptr.vmem [resolvable:$true] %s444_s8 }
  0x1a   : > { %v227_v5 = vld [vmem:[%s224_s13] sm:$0xff]  ;;  %s606_s13 = scalar_lea.vmem %s799_s8, 256  ;;  %s610_s14 = sshll.u32 %s688_s18, 4  ;;  %s611_s14 = int_to_ptr.vmem [resolvable:$false] %s610_s14 }
  0x1b   : > { %v231_v6 = vcombine.high %v227_v5, %v227_v5  ;;  %p607_p12 = scmp.ne.s32.totalorder %s799_s8, %s606_s13  ;;  %s612_s21 = scalar_lea.vmem %s611_s14, 512 }
  0x1c   : > { %p613_p1 = scmp.lt.s32.totalorder %s799_s8, %s611_s14  ;;  %p614_p2 = scmp.lt.s32.totalorder %s612_s21, %s606_s13 }
  0x1d   : > { %528 = vmatprep.subr.msk.mxu1 %vm239_vm0, %v231_v6  ;;  %p608_p13 = pnand %p607_p12, %p754_p4 }
  0x1e   : > { %529 = vmatpush1.msk.msra.mxu1 %vm239_vm0, %v227_v5  ;;  %p615_p3 = por %p614_p2, %p613_p1 }
  0x1f   : > { %530 = vmatmul.mubr.msk.f32.vlgmr.msra.gmra.mrb[0].mxu1 %vm232_vm1, %v228_v7  ;;  %p609_p0 = pneg %p608_p13 }
  0x20   : > { %314 = vmatprep.mubr.f32.mxu1 %v686_v0 }
  0x21   : > { %p616_p5 = pnand %p615_p3, %p609_p0 }
  0x23   : > { %531 = vmatmul.mubr.msk.f32.gmra.mrb[2].mxu1 %vm232_vm1, %v229_v8 }
  0x90   : > { %v325_v9 = vpop.permute.xlu0 %324  ;;  %v344_v22 = vpop.permute.xlu1 %343 }
  0x94   : > { %v335_v19 = vpop.permute.xlu0 %334 }
  0xf2   : > { %v310_v10 = vpop.f32.mrb[0].mxu1 }
  0xf3   : > { %v327_v11 = vadd.f32 %v325_v9, %v310_v10  ;;  %v312_v12 = vpop.f32.mrb[1].mxu1 }
  0xf4   : > { %v328_v13 = vadd.f32 %v325_v9, %v312_v12 }
  0xf5   : > { %v329_v16 = vmax.f32 %v327_v11, 0.0 }
  0xf6   : > { %v316_v14 = vpop.f32.mrb[2].mxu1  ;;  %v330_v15 = vmax.f32 %v328_v13, 0.0 }
  0xf7   : > { %v318_v17 = vpop.f32.mrb[3].mxu1  ;;  %v337_v20 = vadd.f32 %v335_v19, %v316_v14 }
  0xf8   : > { %350 = vmatprep.subr.mxu0 %v330_v15  ;;  %v338_v21 = vadd.f32 %v335_v19, %v318_v17 }
  0xf9   : > { %351 = vmatpush1.msra.mxu0 %v329_v16  ;;  %v541_v23 = vadd.f32 %v344_v22, %v337_v20 }
  0xfa   : > { %532 = vmatmul.mubr.msk.f32.vlgmr.msra.gmra.mrb[0].mxu0 %vm346_vm2, %v339_v18  ;;  %v544_v24 = vadd.f32 %v344_v22, %v338_v21 }
 0x1cd   : > { %v416_v25 = vpop.f32.mrb[0].mxu0 }
 0x1ce   : > { %v542_v26 = vadd.f32 %v541_v23, %v416_v25  ;;  %v418_v27 = vpop.f32.mrb[1].mxu0 }
 0x1cf   : > { %v545_v28 = vadd.f32 %v544_v24, %v418_v27 }
 0x1d0   : > { %v423_v29 = vmax.f32 %v542_v26, 0.0 }
 0x1d1   : > { %v424_v30 = vmax.f32 %v545_v28, 0.0 }
 0x1d2   : > { %425 = vst [vmem:[%s215_s7] sm:$0xff] %v423_v29 }
 0x1d3   : > { %426 = vst [vmem:[%s215_s7 + $0x8] sm:$0xff] %v424_v30 }
 0x1d4   : > { %619 = shalt.err (!%p616_p5)
}
 0x1d5   : > { %s620_s22 = scalar_lea.hbm %s797_s11, 256  ;;  %s624_s29 = scalar_lea.hbm %s848_s4, 512 }
 0x1d6   : > { %p621_p6 = scmp.ne.s32.totalorder %s797_s11, %s620_s22  ;;  %p625_p10 = scmp.lt.u32.totalorder %s797_s11, %s848_s4 }
 0x1d7   : > { %p626_p11 = scmp.lt.u32.totalorder %s624_s29, %s620_s22  ;;  %p628_p13 = scmp.lt.u32.totalorder %s620_s22, %s797_s11 }
 0x1d8   : > { %p622_p7 = pnand %p621_p6, %p754_p4 }
 0x1d9   : > { %p627_p12 = por %p626_p11, %p625_p10 }
 0x1da   : > { %p623_p9 = pneg %p622_p7 }
 0x1db   : > { %p629_p0 = por %p628_p13, %p627_p12 }
 0x1dd   : > { %p630_p1 = pnand %p629_p0, %p623_p9 }
 0x1df   : > { %633 = shalt.err (!%p630_p1)
}
 0x1e0   : > { %546 = dma.vmem_to_hbm [thread:$0]  (%p754_p4), %s799_s8, 256, %s797_s11, %s428_s12  }
 0x1e1 PF: > { %p552_p2 = scmp.ge.s32.totalorder %s684_s20, 2  ;;  %s456_s6 = sand.u32 1, %s664_s15  }
 0x1e2   : > { %s457_s7 = scalar_lea.sflag [#allocation3], %s456_s6 }
 0x1e3   : > { %p549_p3 = pnand %p552_p2, %p761_p8 }
 0x1e5   : > { %659 = dma.done.wait (!%p549_p3), %s457_s7, 256  }
 0x1e6   : > { %661 = vsyncadd (!%p549_p3), %s457_s7, 4294967040  ;;  %s17_s20 = sadd.s32 1, %s684_s20   ;;  %s851_s15 = smov %s668_s16 }
 0x1e7   : > { %p14_p5 = scmp.ge.s32.totalorder %s17_s20, 4   ;;  %s852_s16 = smov %s672_s17 }
 0x1e8   : > { %s853_s17 = smov %s767_s28  ;;  %s854_s18 = smov %s680_s19 }
 0x1e9   : > { %s855_s19 = smov %s857_s23  ;;  %16 = sbr.rel (!%p14_p5) target bundleno = 4 (0x4), region = 71 }
 0x1f0   :  { %462 = vsyncpa [#allocation3], 1 }
 0x1f1   :  { %464 = vsyncpa [#allocation3 + $0x1], 1 }

</bundles_post_ra>
